<compile_context>
chip_gen: v6e
topology: v6e:2x2x1
jax: 0.10.0
libtpu: 0.0.40
codegen_flags: <defaults>
</compile_context>

<pallas_src>
import functools

import jax
import jax.numpy as jnp
from jax.experimental import pallas as pl
from jax.experimental.pallas import tpu as pltpu


def _lane_fold(loss):
    """Fold a (1, TM) row (TM multiple of 128) into (1, 128) lane-wise partial sums.

    Uses 8 interleaved accumulators plus a tree combine so the dependent add chain is
    ~TM/1024 + 3 instead of TM/128 - 1.
    """
    tm = loss.shape[1]
    n = tm // 128
    if n == 1:
        return loss
    n_acc = min(8, n)
    accs = [loss[:, k * 128:(k + 1) * 128] for k in range(n_acc)]
    for k in range(n_acc, n):
        accs[k % n_acc] = accs[k % n_acc] + loss[:, k * 128:(k + 1) * 128]
    while len(accs) > 1:
        nxt = [accs[j] + accs[j + 1] for j in range(0, len(accs) - 1, 2)]
        if len(accs) % 2:
            nxt.append(accs[-1])
        accs = nxt
    return accs[0]


def _focal_block(x, t, a, valid, gamma):
    """Per-block focal loss.

    x: (C, TM) f32 logits (classes on sublanes), t: (1, TM) i32 targets,
    a: (C, 1) f32 per-class alpha, valid: (1, TM) bool.  Returns (1, TM) f32 loss
    (zero on invalid columns).
    """
    c, tm = x.shape
    t_safe = jnp.where(valid, t, 0)                               # ignore/-1/garbage -> class 0

    # log_softmax over the class (sublane) axis, never materialized:
    x_max = jnp.max(x, axis=0, keepdims=True)                     # (1, TM)
    shifted = x - x_max                                           # (C, TM)
    es = jnp.exp(shifted)                                         # (C, TM)  (the only big exp)
    sumexp = jnp.sum(es, axis=0, keepdims=True)                   # (1, TM), >= 1

    classes = jax.lax.broadcasted_iota(jnp.int32, (c, tm), 0)     # (C, TM)
    sel = classes == t_safe                                       # boolean one-hot

    sel_shift = jnp.sum(jnp.where(sel, shifted, 0.0), axis=0, keepdims=True)  # shifted[t]
    sel_es = jnp.sum(jnp.where(sel, es, 0.0), axis=0, keepdims=True)          # exp(shifted)[t]
    at = jnp.sum(jnp.where(sel, a, 0.0), axis=0, keepdims=True)               # alpha[t]

    logpt = sel_shift - jnp.log(sumexp)                           # log softmax gathered at t
    pt = sel_es / sumexp                                          # exp(logpt), exact divide

    # gamma is a Python int by default -> integer_pow (VPU), not an EUP pow.
    loss = -1.0 * (1.0 - pt) ** gamma * (logpt * at)
    return jnp.where(valid, loss, 0.0)


def _focal_loss_kernel(x_ref, t_ref, alpha_ref, out_ref, *, gamma, tail_valid):
    x = x_ref[...].astype(jnp.float32)        # (C, TM) logits
    t = t_ref[...].astype(jnp.int32)          # (1, TM) targets
    a = alpha_ref[...].astype(jnp.float32)    # (C, 1)  per-class alpha

    def emit(x_blk, valid):
        loss = _focal_block(x_blk, t, a, valid, gamma)
        out_ref[...] = _lane_fold(loss)       # (1, 128) lane-dense partial sums

    if tail_valid is None:
        # Spatial extent divides the tile: no tail anywhere, hot path only.
        emit(x, t != -1)
    else:
        # Only the last spatial block is ragged; everything else skips the extra
        # masking / sanitization.  Predicated purely on the block index, so it is
        # safe under ("parallel", "parallel") grid semantics (no cross-step state).
        is_last = pl.program_id(1) == pl.num_programs(1) - 1

        @pl.when(jnp.logical_not(is_last))
        def _():
            emit(x, t != -1)

        @pl.when(is_last)
        def _():
            col = jax.lax.broadcasted_iota(jnp.int32, t.shape, 1)
            in_bounds = col < tail_valid                         # static python int
            # Sanitize possibly-garbage tail logits so exp/log never see NaN/Inf.
            emit(jnp.where(in_bounds, x, 0.0),
                 jnp.logical_and(in_bounds, t != -1))


def focal_loss_v1(logits, target, alpha, *, gamma=2, size_average=True, tile_m=None):
    """Focal loss (FocalLossV1 forward).

    logits: (N, C, *spatial) or (M, C); target: (N, *spatial) or (M,), int, -1 = ignore;
    alpha: (C,) per-class weights.
    """
    if logits.ndim > 2:
        n_batch, c = logits.shape[0], logits.shape[1]
        x3 = logits.reshape(n_batch, c, -1)          # free row-major view (N, C, S)
        t3 = target.reshape(n_batch, 1, -1)          # (N, 1, S)
    else:
        # Rare 2-D (M, C) path: classes must land on sublanes, which BlockSpec cannot
        # express without a relayout, so keep the explicit transpose here only.
        c = logits.shape[1]
        n_batch = 1
        x3 = logits.T.reshape(1, c, -1)
        t3 = target.reshape(1, 1, -1)

    # Accept narrow dtypes as-is (less HBM traffic); only widen what the kernel can't take.
    if x3.dtype not in (jnp.float32, jnp.bfloat16, jnp.float16):
        x3 = x3.astype(jnp.float32)
    if not (jnp.issubdtype(t3.dtype, jnp.signedinteger) and t3.dtype.itemsize <= 4):
        t3 = t3.astype(jnp.int32)

    m_total = int(target.size)                       # divisor for .mean() (incl. ignored)
    s = x3.shape[2]

    # Tiny-S guard: pad the lane axis up to 128 (negligible copy) so block shapes are
    # legal; padded targets are -1 so they are masked by the ordinary ignore path.
    if s < 128:
        pad = 128 - s
        x3 = jnp.pad(x3, ((0, 0), (0, 0), (0, pad)))
        t3 = jnp.pad(t3, ((0, 0), (0, 0), (0, pad)), constant_values=-1)
        s = 128

    # Tile scales inversely with C: ~0.5-2 MiB logit slab per step, capped at 32768 rows
    # (bounds the in-kernel lane fold and keeps VMEM use <~16 MiB on every generation).
    if tile_m is None:
        tile = (524288 // max(int(c), 1)) // 128 * 128
        tile = max(128, min(32768, tile))
    else:
        tile = max(128, (int(tile_m) // 128) * 128)
    tile = min(tile, pl.cdiv(s, 128) * 128)

    grid_s = pl.cdiv(s, tile)
    rem = s % tile
    tail_valid = None if rem == 0 else rem           # static: columns valid in last block

    alpha_c1 = jnp.asarray(alpha, dtype=jnp.float32).reshape(c, 1)

    out = pl.pallas_call(
        functools.partial(_focal_loss_kernel, gamma=gamma, tail_valid=tail_valid),
        out_shape=jax.ShapeDtypeStruct((n_batch, grid_s, 1, 128), jnp.float32),
        grid_spec=pltpu.PrefetchScalarGridSpec(
            num_scalar_prefetch=0,
            grid=(n_batch, grid_s),
            in_specs=[
                pl.BlockSpec((None, c, tile), lambda nb, sb: (nb, 0, sb)),   # logits (C, tile)
                pl.BlockSpec((None, 1, tile), lambda nb, sb: (nb, 0, sb)),   # targets (1, tile)
                pl.BlockSpec((c, 1), lambda nb, sb: (0, 0)),                 # alpha, resident
            ],
            out_specs=pl.BlockSpec((None, None, 1, 128), lambda nb, sb: (nb, sb, 0, 0)),
        ),
        compiler_params=pltpu.CompilerParams(
            dimension_semantics=("parallel", "parallel"),   # independent blocks (v7x 2-TC)
            vmem_limit_bytes=48 * 1024 * 1024,              # headroom on v5e, < v7x 64 MiB/TC
        ),
    )(x3, t3, alpha_c1)

    total = jnp.sum(out)                              # tiny (N*grid_s*128) final reduce
    if size_average:
        return total / jnp.float32(m_total)           # torch .mean(): divide by total count
    return total


def _reference(logits, target, alpha, gamma=2, size_average=True):
    """Pure-JAX mirror of the PyTorch module's forward."""
    c = logits.shape[1]
    if logits.ndim > 2:
        x = jnp.moveaxis(logits.reshape(logits.shape[0], c, -1), 1, 2).reshape(-1, c)
    else:
        x = logits
    x = x.astype(jnp.float32)
    t = target.reshape(-1).astype(jnp.int32)
    mask = (t != -1)
    tm = jnp.where(mask, t, 0)
    logp = jax.nn.log_softmax(x, axis=-1)
    logpt = jnp.take_along_axis(logp, tm[:, None], axis=1)[:, 0]
    pt = jnp.exp(logpt)
    at = jnp.asarray(alpha, jnp.float32)[tm]
    loss = -1.0 * (1.0 - pt) ** gamma * (logpt * at)
    loss = loss * mask.astype(jnp.float32)
    return loss.mean() if size_average else loss.sum()


if __name__ == "__main__":
    key = jax.random.PRNGKey(0)
    k1, k2, k3, k4, k5, k6 = jax.random.split(key, 6)

    alpha = jnp.array([0.25, 0.75, 0.5, 1.0], dtype=jnp.float32)

    # Case 1: canonical small NCHW shape (S = 256 -> single lane-dense block, no tail).
    N, C, H, W = 2, 4, 16, 16
    logits = jax.random.normal(k1, (N, C, H, W), dtype=jnp.float32)
    target = jax.random.randint(k2, (N, H, W), 0, C).astype(jnp.int32)
    target = target.at[0, 0, :4].set(-1)
    target = target.at[1, 5, 7].set(-1)

    loss = jax.block_until_ready(
        focal_loss_v1(logits, target, alpha, gamma=2, size_average=True))
    ref = _reference(logits, target, alpha, gamma=2, size_average=True)
    assert jnp.allclose(loss, ref, rtol=1e-5, atol=1e-6), (loss, ref)

    # Case 2: ragged S (2 * 15 * 17 per image = 255) with tile_m=128 -> two spatial
    # blocks, last-block-only tail masking, multi-block partial sums.
    H2, W2 = 15, 17
    logits2 = jax.random.normal(k3, (N, C, H2, W2), dtype=jnp.float32)
    target2 = jax.random.randint(k4, (N, H2, W2), 0, C).astype(jnp.int32)
    target2 = target2.at[0, 3, :5].set(-1)

    loss2 = jax.block_until_ready(
        focal_loss_v1(logits2, target2, alpha, gamma=2, size_average=True, tile_m=128))
    ref2 = _reference(logits2, target2, alpha, gamma=2, size_average=True)
    assert jnp.allclose(loss2, ref2, rtol=1e-5, atol=1e-6), (loss2, ref2)

    # Case 3: sum reduction, single ragged block.
    loss3 = jax.block_until_ready(
        focal_loss_v1(logits2, target2, alpha, gamma=2, size_average=False, tile_m=256))
    ref3 = _reference(logits2, target2, alpha, gamma=2, size_average=False)
    assert jnp.allclose(loss3, ref3, rtol=1e-5, atol=1e-5), (loss3, ref3)

    # Case 4: bf16 logits consumed directly (cast to f32 in-kernel, math stays f32).
    logits_bf16 = logits.astype(jnp.bfloat16)
    loss4 = jax.block_until_ready(
        focal_loss_v1(logits_bf16, target, alpha, gamma=2, size_average=True))
    ref4 = _reference(logits_bf16.astype(jnp.float32), target, alpha, gamma=2,
                      size_average=True)
    assert jnp.allclose(loss4, ref4, rtol=1e-5, atol=1e-6), (loss4, ref4)

    # Case 5: 2-D (M, C) path (explicit transpose branch), ragged single block.
    M = 300
    logits5 = jax.random.normal(k5, (M, C), dtype=jnp.float32)
    target5 = jax.random.randint(k6, (M,), 0, C).astype(jnp.int32)
    target5 = target5.at[:7].set(-1)
    loss5 = jax.block_until_ready(
        focal_loss_v1(logits5, target5, alpha, gamma=2, size_average=True))
    ref5 = _reference(logits5, target5, alpha, gamma=2, size_average=True)
    assert jnp.allclose(loss5, ref5, rtol=1e-5, atol=1e-6), (loss5, ref5)

    print("KERNEL_OK")
</pallas_src>

<mosaic_0001>
module attributes {stable_mosaic.version = 11 : i64} {
  func.func @_focal_loss_kernel(%arg0: i32, %arg1: i32, %arg2: memref<1x4x256xf32, #tpu.memory_space<vmem>>, %arg3: memref<1x1x256xi32, #tpu.memory_space<vmem>>, %arg4: memref<4x1xf32, #tpu.memory_space<vmem>>, %arg5: memref<1x1x1x128xf32, #tpu.memory_space<vmem>>) attributes {dimension_semantics = [#tpu.dimension_semantics<parallel>, #tpu.dimension_semantics<parallel>], iteration_bounds = array<i64: 2, 1>, scalar_prefetch = 0 : i64, scratch_operands = 0 : i64, tpu.core_type = #tpu.core_type<tc>, window_params = [{transform_indices = @transform_0, window_bounds = array<i64: 1, 4, 256>}, {transform_indices = @transform_1, window_bounds = array<i64: 1, 1, 256>}, {pipeline_mode = #tpu.pipeline_mode<synchronous>, transform_indices = @transform_2, window_bounds = array<i64: 4, 1>}, {transform_indices = @transform_3, window_bounds = array<i64: 1, 1, 1, 128>}]} {
    %c0 = arith.constant 0 : index
    %c0_0 = arith.constant 0 : index
    %c0_1 = arith.constant 0 : index
    %0 = vector.load %arg2[%c0, %c0_0, %c0_1] : memref<1x4x256xf32, #tpu.memory_space<vmem>>, vector<1x4x256xf32>
    %1 = vector.shape_cast %0 : vector<1x4x256xf32> to vector<4x256xf32>
    %c0_2 = arith.constant 0 : index
    %c0_3 = arith.constant 0 : index
    %c0_4 = arith.constant 0 : index
    %2 = vector.load %arg3[%c0_2, %c0_3, %c0_4] : memref<1x1x256xi32, #tpu.memory_space<vmem>>, vector<1x1x256xi32>
    %3 = vector.shape_cast %2 : vector<1x1x256xi32> to vector<1x256xi32>
    %c0_5 = arith.constant 0 : index
    %c0_6 = arith.constant 0 : index
    %4 = vector.load %arg4[%c0_5, %c0_6] : memref<4x1xf32, #tpu.memory_space<vmem>>, vector<4x1xf32>
    %c-1_i32 = arith.constant -1 : i32
    %5 = vector.broadcast %c-1_i32 : i32 to vector<1x256xi32>
    %6 = arith.cmpi ne, %3, %5 : vector<1x256xi32>
    %c0_i32 = arith.constant 0 : i32
    %7 = vector.broadcast %c0_i32 : i32 to vector<1x256xi32>
    %8 = arith.select %6, %3, %7 : vector<1x256xi1>, vector<1x256xi32>
    %cst = arith.constant dense<0xFF800000> : vector<256xf32>
    %9 = vector.multi_reduction <maximumf>, %1, %cst [0] : vector<4x256xf32> to vector<256xf32>
    %10 = vector.shape_cast %9 : vector<256xf32> to vector<1x256xf32>
    %11 = vector.broadcast %10 : vector<1x256xf32> to vector<4x256xf32>
    %12 = arith.subf %1, %11 : vector<4x256xf32>
    %13 = math.exp %12 : vector<4x256xf32>
    %cst_7 = arith.constant dense<0.000000e+00> : vector<256xf32>
    %14 = vector.multi_reduction <add>, %13, %cst_7 [0] : vector<4x256xf32> to vector<256xf32>
    %15 = vector.shape_cast %14 : vector<256xf32> to vector<1x256xf32>
    %16 = tpu.iota {dimensions = array<i32: 0>} : vector<4x256xi32>
    %17 = vector.broadcast %8 : vector<1x256xi32> to vector<4x256xi32>
    %18 = arith.cmpi eq, %16, %17 : vector<4x256xi32>
    %cst_8 = arith.constant 0.000000e+00 : f32
    %19 = vector.broadcast %cst_8 : f32 to vector<4x256xf32>
    %20 = arith.select %18, %12, %19 : vector<4x256xi1>, vector<4x256xf32>
    %cst_9 = arith.constant dense<0.000000e+00> : vector<256xf32>
    %21 = vector.multi_reduction <add>, %20, %cst_9 [0] : vector<4x256xf32> to vector<256xf32>
    %22 = vector.shape_cast %21 : vector<256xf32> to vector<1x256xf32>
    %cst_10 = arith.constant 0.000000e+00 : f32
    %23 = vector.broadcast %cst_10 : f32 to vector<4x256xf32>
    %24 = arith.select %18, %13, %23 : vector<4x256xi1>, vector<4x256xf32>
    %cst_11 = arith.constant dense<0.000000e+00> : vector<256xf32>
    %25 = vector.multi_reduction <add>, %24, %cst_11 [0] : vector<4x256xf32> to vector<256xf32>
    %26 = vector.shape_cast %25 : vector<256xf32> to vector<1x256xf32>
    %cst_12 = arith.constant 0.000000e+00 : f32
    %27 = vector.shape_cast %4 : vector<4x1xf32> to vector<4x1xf32>
    %28 = vector.broadcast %27 : vector<4x1xf32> to vector<4x256xf32>
    %29 = vector.broadcast %cst_12 : f32 to vector<4x256xf32>
    %30 = arith.select %18, %28, %29 : vector<4x256xi1>, vector<4x256xf32>
    %cst_13 = arith.constant dense<0.000000e+00> : vector<256xf32>
    %31 = vector.multi_reduction <add>, %30, %cst_13 [0] : vector<4x256xf32> to vector<256xf32>
    %32 = vector.shape_cast %31 : vector<256xf32> to vector<1x256xf32>
    %33 = math.log %15 : vector<1x256xf32>
    %34 = arith.subf %22, %33 : vector<1x256xf32>
    %35 = arith.divf %26, %15 : vector<1x256xf32>
    %cst_14 = arith.constant 1.000000e+00 : f32
    %36 = vector.broadcast %cst_14 : f32 to vector<1x256xf32>
    %37 = arith.subf %36, %35 : vector<1x256xf32>
    %38 = arith.mulf %37, %37 : vector<1x256xf32>
    %cst_15 = arith.constant -1.000000e+00 : f32
    %39 = vector.broadcast %cst_15 : f32 to vector<1x256xf32>
    %40 = arith.mulf %39, %38 : vector<1x256xf32>
    %41 = arith.mulf %34, %32 : vector<1x256xf32>
    %42 = arith.mulf %40, %41 : vector<1x256xf32>
    %cst_16 = arith.constant 0.000000e+00 : f32
    %43 = vector.broadcast %cst_16 : f32 to vector<1x256xf32>
    %44 = arith.select %6, %42, %43 : vector<1x256xi1>, vector<1x256xf32>
    %45 = vector.extract_strided_slice %44 {offsets = [0, 0], sizes = [1, 128], strides = [1, 1]} : vector<1x256xf32> to vector<1x128xf32>
    %46 = vector.extract_strided_slice %44 {offsets = [0, 128], sizes = [1, 128], strides = [1, 1]} : vector<1x256xf32> to vector<1x128xf32>
    %47 = arith.addf %45, %46 : vector<1x128xf32>
    %c0_17 = arith.constant 0 : index
    %c0_18 = arith.constant 0 : index
    %c0_19 = arith.constant 0 : index
    %c0_20 = arith.constant 0 : index
    %48 = vector.load %arg5[%c0_17, %c0_18, %c0_19, %c0_20] : memref<1x1x1x128xf32, #tpu.memory_space<vmem>>, vector<1x1x1x128xf32>
    %49 = vector.shape_cast %48 : vector<1x1x1x128xf32> to vector<1x128xf32>
    %50 = vector.shape_cast %47 : vector<1x128xf32> to vector<1x1x1x128xf32>
    tpu.vector_store %arg5[%c0_17, %c0_18, %c0_19, %c0_20], %50 {strides = array<i32>} : memref<1x1x1x128xf32, #tpu.memory_space<vmem>>, vector<1x1x1x128xf32>,
    return
  }
  func.func @transform_0(%arg0: i32, %arg1: i32) -> (i32, i32, i32) {
    %c0_i32 = arith.constant 0 : i32
    %c0_i32_0 = arith.constant 0 : i32
    return %arg0, %c0_i32, %arg1 : i32, i32, i32
  }
  func.func @transform_1(%arg0: i32, %arg1: i32) -> (i32, i32, i32) {
    %c0_i32 = arith.constant 0 : i32
    %c0_i32_0 = arith.constant 0 : i32
    return %arg0, %c0_i32, %arg1 : i32, i32, i32
  }
  func.func @transform_2(%arg0: i32, %arg1: i32) -> (i32, i32) {
    %c0_i32 = arith.constant 0 : i32
    %c0_i32_0 = arith.constant 0 : i32
    %c0_i32_1 = arith.constant 0 : i32
    return %c0_i32, %c0_i32_0 : i32, i32
  }
  func.func @transform_3(%arg0: i32, %arg1: i32) -> (i32, i32, i32, i32) {
    %c0_i32 = arith.constant 0 : i32
    %c0_i32_0 = arith.constant 0 : i32
    %c0_i32_1 = arith.constant 0 : i32
    return %arg0, %arg1, %c0_i32, %c0_i32_0 : i32, i32, i32, i32
  }
}

</mosaic_0001>

<bundles_post_ra>
// kernel: tpu_custom_call.1
= control target key start
LH: loop header
LB: loop body
LE: loop exit
PB: predicated region body
PF: predicated region fallthrough
CT: control target
= control target key end

     0   :  { %8 = vsyncpa [#allocation3], 0  ;;  %s908_s0 = inlined_call_operand.hbm [shape: f32[2,4,256], index: 0, kind: input, shape index: {}]   ;;  %s909_s1 = inlined_call_operand.vmem [shape: s32[2,1,256], index: 1, kind: input, shape index: {}]   ;;  %s910_s2 = inlined_call_operand.vmem [shape: f32[4,1], index: 2, kind: input, shape index: {}]   ;;  %s911_s3 = inlined_call_operand.hbm [shape: f32[2,1,1,128], index: 3, kind: output, shape index: {}]  }
   0x1   :  { %10 = vsyncpa [#allocation3 + $0x1], 0 }
   0x2   :  { %11 = vsyncpa [#allocation4], 0 }
   0x3   :  { %13 = vsyncpa [#allocation4 + $0x1], 0  ;;  %s728_s12 = smov 0   ;;  %s730_s13 = smov 0  }
   0x4   :  { %s732_s14 = smov 0   ;;  %s734_s15 = smov 0  }
   0x5   :  { %s736_s16 = smov 0   ;;  %s738_s17 = smov 0  }
   0x6 LB: > { %s504_s18 = sadd.s32 4294967295, %s702_s17   ;;  %s505_s19 = sadd.s32 4294967294, %s702_s17   ;;  %s702_s17 = sphi %s738_s17, %s19_s17   ;;  %s698_s16 = sphi %s736_s16, %s923_s16   ;;  %s694_s15 = sphi %s734_s15, %s922_s15   ;;  %s690_s14 = sphi %s732_s14, %s921_s14   ;;  %s686_s13 = sphi %s730_s13, %s920_s13   ;;  %s682_s12 = sphi %s728_s12, %s919_s12  }
   0x7   : > { %s31_s20 = sadd.s32 1, %s698_s16  ;;  %s40_s21 = sadd.s32 1, %s690_s14 }
   0x8   : > { %p33_p0 = scmp.ge.s32.totalorder %s31_s20, 2  ;;  %p47_p1 = scmp.ne.s32.totalorder %s690_s14, %s686_s13 }
   0x9   : > { %p48_p2 = scmp.eq.s32.totalorder %s702_s17, 0  ;;  %p53_p3 = scmp.ne.s32.totalorder %s686_s13, %s682_s12 }
   0xa   : > { %s925_s20 = smov (%p33_p0, %s31_s20), 0  ;;  %p54_p5 = scmp.eq.s32.totalorder %s504_s18, 0 }
   0xb   : > { %p769_p4 = por %p48_p2, %p47_p1  ;;  %s35_s23 = ssub.s32 %s698_s16, %s925_s20 }
   0xc   : > { %p128_p6 = scmp.eq.s32.totalorder %s504_s18, 1  ;;  %p38_p7 = scmp.eq.s32.totalorder %s35_s23, 0 }
   0xd   : > { %p775_p8 = por %p54_p5, %p53_p3  ;;  %p134_p10 = scmp.eq.s32.totalorder %s505_s19, 1 }
   0xe   : > { %p779_p9 = por %p128_p6, %p47_p1  ;;  %p530_p13 = scmp.lt.s32.totalorder %s702_s17, 2 }
   0xf   : > { %s784_s26 = scalar_select %p38_p7, %s690_s14, %s40_s21  }
  0x10   : > { %p786_p11 = por %p134_p10, %p53_p3  ;;  %s157_s28 = sand.u32 1, %s690_s14  }
  0x11   : > { %s508_s29 = sshll.u32 %s157_s28, 3  ;;  %s517_s30 = sshll.u32 %s698_s16, 7 }
  0x12   : > { %s915_s27 = scalar_select %p786_p11, 1, 0 }
  0x13   : > { %s169_s6 = scalar_lea.hbm %s908_s0, %s517_s30  ;;  %s161_s7 = scalar_lea.vmem [#allocation2], %s508_s29 }
  0x14   : > { %s171_s8 = sshll.u32 %s161_s7, 4  ;;  %p799_p0 = pnand %p530_p13, %p769_p4  ;;  %s172_s8 = int_to_ptr.vmem [resolvable:$true] %s171_s8 }
  0x15   : > { %p511_p1 = scmp.ge.s32.totalorder %s702_s17, 1  ;;  %p188_p2 = scmp.lt.s32.totalorder %s702_s17, 3 }
  0x16   : > { %s158_s10 = scalar_lea.sflag [#allocation3], %s157_s28  ;;  %p596_p3 = pneg %p799_p0 }
  0x17   : > { %s607_s11 = scalar_lea.vmem %s172_s8, 128  ;;  %s704_s18 = smov [#allocation2]  }
  0x18   : > { %p608_p5 = scmp.ne.s32.totalorder %s172_s8, %s607_s11  ;;  %s612_s19 = sshll.u32 %s704_s18, 4  ;;  %s613_s19 = int_to_ptr.vmem [resolvable:$false] %s612_s19 }
  0x19   : > { %s614_s21 = scalar_lea.vmem %s613_s19, 256  ;;  %p615_p10 = scmp.lt.s32.totalorder %s172_s8, %s613_s19 }
  0x1a   : > { %p610_p6 = pnand %p608_p5, %p596_p3  ;;  %p616_p12 = scmp.lt.s32.totalorder %s614_s21, %s607_s11 }
  0x1c   : > { %p611_p7 = pneg %p610_p6  ;;  %p617_p4 = por %p616_p12, %p615_p10 }
  0x1e   : > { %p618_p13 = pnand %p617_p4, %p611_p7 }
  0x20   : > { %621 = shalt.err (!%p618_p13)
}
  0x21   : > { %525 = dma.hbm_to_vmem [thread:$0]  (!%p799_p0), %s169_s6, 128, %s172_s8, %s158_s10  }
  0x22   : > { %p189_p11 = pnand %p511_p1, %p188_p2 }
  0x23   : > { %s814_s22 = sand.u32 (!%p189_p11), 1, %s686_s13  }
  0x24   : > { %192 = sbr.rel (%p189_p11) target bundleno = 210 (0xd2), region = 32  ;;  %s512_s23 = sshll.u32 (!%p189_p11), %s814_s22, 3 }
  0x25   : > { %s195_s28 = scalar_lea.sflag (!%p189_p11), [#allocation3], %s814_s22  ;;  %s198_s29 = scalar_lea.vmem (!%p189_p11), [#allocation2], %s512_s23 }
  0x29   : > { %673 = dma.done.wait (%p775_p8), %s195_s28, 128  }
  0x2a   : > { %675 = vsyncadd (%p775_p8), %s195_s28, 4294967168  ;;  %v705_v0 = vmov 0   ;;  %v240_v1 = vld [vmem:[%s910_s2] sm:$0xf]  ;;  %vm246_vm0 = vcmask 1043456   ;;  %p230_p8 = scmp.lt.s32.totalorder %s694_s15, 1  ;;  %v285_v22 = vlaneseq }
  0x2b   : > { %582 = vset.pattern.permute.xlu0 %v705_v0  ;;  %v238_v2 = vld [vmem:[%s198_s29] sm:$0xff]  ;;  %s514_s9 = sshll.u32 %s694_s15, 4  ;;  %s227_s10 = scalar_lea.vmem [#allocation5], %s814_s22 }
  0x2c   : > { %334 = vperm.xlu0 %582, %v240_v1   ;;  %v244_v3 = vcombine.high %v238_v2, %v238_v2  ;;  %v247_v4 = vsel %vm246_vm0, %v238_v2, -inf  ;;  %s231_s24 = scalar_select %p230_p8, %s694_s15, 1  ;;  %v834_v25 = vshrl.u32 %v285_v22, 7 }
  0x2d   : > { %v248_v6 = vrot.slane %v247_v4, 4  ;;  %s411_s11 = sshll.u32 %s227_s10, 4  ;;  %s409_s21 = scalar_lea.hbm %s911_s3, %s514_s9  ;;  %s412_s11 = int_to_ptr.vmem [resolvable:$true] %s411_s11 }
  0x2e   : > { %v254_v5 = vsel %vm246_vm0, %v244_v3, -inf  ;;  %s513_s5 = sshll.u32 %s231_s24, 1  ;;  %v289_v28 = vsub.s32 0, %v834_v25  ;;  %v293_v29 = vsub.s32 1, %v834_v25  ;;  %s398_s23 = scalar_lea.sflag [#allocation4], %s814_s22 }
  0x2f   : > { %v255_v7 = vrot.slane %v254_v5, 4  ;;  %v249_v8 = vmax.f32 %v247_v4, %v248_v6  ;;  %s236_s8 = scalar_lea.vmem %s909_s1, %s513_s5  ;;  %s622_s28 = scalar_lea.vmem %s412_s11, 16 }
  0x30   : > { %v832_v24 = vld [vmem:[%s236_s8] sm:$0x3]  ;;  %p623_p11 = scmp.ne.s32.totalorder %s412_s11, %s622_s28  ;;  %s707_s29 = smov [#allocation5]  }
  0x31   : > { %v256_v9 = vmax.f32 %v254_v5, %v255_v7  ;;  %v250_v10 = vrot.slane %v249_v8, 2  ;;  %vm241_vm1 = vcmp.ne.s32.totalorder %v832_v24, 4294967295  ;;  %s626_s30 = sshll.u32 %s707_s29, 4  ;;  %s627_s30 = int_to_ptr.vmem [resolvable:$false] %s626_s30 }
  0x32   : > { %v242_v31 = vsel %vm241_vm1, %v832_v24, 0  ;;  %p624_p12 = pnand %p623_p11, %p779_p9  ;;  %s628_s15 = scalar_lea.vmem %s627_s30, 32 }
  0x33   : > { %v257_v11 = vrot.slane %v256_v9, 2  ;;  %v251_v12 = vmax.f32 %v249_v8, %v250_v10  ;;  %v290_v34 = vrot.slane %v242_v31, %v289_v28  ;;  %v294_v35 = vrot.slane %v242_v31, %v293_v29  ;;  %p629_p1 = scmp.lt.s32.totalorder %s412_s11, %s627_s30  ;;  %p630_p2 = scmp.lt.s32.totalorder %s628_s15, %s622_s28 }
  0x34   : > { %p625_p0 = pneg %p624_p12 }
  0x35   : > { %v258_v13 = vmax.f32 %v256_v9, %v257_v11  ;;  %v252_v14 = vrot.slane %v251_v12, 1  ;;  %vm295_vm2 = vcmp.eq.s32.totalorder %v834_v25, %v290_v34  ;;  %vm296_vm3 = vcmp.eq.s32.totalorder %v834_v25, %v294_v35  ;;  %p631_p3 = por %p630_p2, %p629_p1 }
  0x37   : > { %v259_v15 = vrot.slane %v258_v13, 1  ;;  %v253_v16 = vmax.f32 %v251_v12, %v252_v14  ;;  %p632_p5 = pnand %p631_p3, %p625_p0 }
  0x39   : > { %v260_v17 = vmax.f32 %v258_v13, %v259_v15 }
  0x3b   : > { %v263_v18 = vcombine.low %v253_v16, %v260_v17 }
  0x3d   : > { %v265_v19 = vsub.f32 %v238_v2, %v263_v18 }
  0x3f   : > { %v266_v20 = vmul.f32 1.442695, %v265_v19  ;;  %v298_v46 = vcombine.high %v265_v19, %v265_v19  ;;  %v300_v51 = vsel %vm295_vm2, %v265_v19, 0.0 }
  0x40   : > { %v302_v56 = vsel %vm246_vm0, %v300_v51, 0.0 }
  0x41   : > { %584 = vpow2.f32 %v266_v20  ;;  %v301_v52 = vsel %vm296_vm3, %v298_v46, 0.0  ;;  %v303_v60 = vrot.slane %v302_v56, 4 }
  0x42   : > { %v309_v57 = vsel %vm246_vm0, %v301_v52, 0.0 }
  0x43   : > { %v310_v61 = vrot.slane %v309_v57, 4  ;;  %v304_v0 = vadd.f32 %v303_v60, %v302_v56 }
  0x45   : > { %v311_v1 = vadd.f32 %v310_v61, %v309_v57  ;;  %v305_v4 = vrot.slane %v304_v0, 2 }
  0x47   : > { %v312_v5 = vrot.slane %v311_v1, 2  ;;  %v306_v10 = vadd.f32 %v305_v4, %v304_v0 }
  0x49   : > { %v313_v11 = vadd.f32 %v312_v5, %v311_v1  ;;  %v307_v17 = vrot.slane %v306_v10, 1 }
  0x4b   : > { %v314_v18 = vrot.slane %v313_v11, 1  ;;  %v308_v31 = vadd.f32 %v307_v17, %v306_v10 }
  0x4e   : > { %v585_v21 = vpop.eup %584 }
  0x4f   : > { %v269_v23 = vcombine.high %v585_v21, %v585_v21  ;;  %v271_v26 = vsel %vm246_vm0, %v585_v21, 0.0  ;;  %v316_v39 = vsel %vm295_vm2, %v585_v21, 0.0 }
  0x50   : > { %v272_v30 = vrot.slane %v271_v26, 4  ;;  %v318_v43 = vsel %vm246_vm0, %v316_v39, 0.0 }
  0x51   : > { %v278_v27 = vsel %vm246_vm0, %v269_v23, 0.0  ;;  %v317_v40 = vsel %vm296_vm3, %v269_v23, 0.0  ;;  %v319_v48 = vrot.slane %v318_v43, 4 }
  0x52   : > { %v279_v32 = vrot.slane %v278_v27, 4  ;;  %v273_v33 = vadd.f32 %v272_v30, %v271_v26  ;;  %v325_v44 = vsel %vm246_vm0, %v317_v40, 0.0 }
  0x53   : > { %v326_v49 = vrot.slane %v325_v44, 4  ;;  %v320_v54 = vadd.f32 %v319_v48, %v318_v43 }
  0x54   : > { %v280_v36 = vadd.f32 %v279_v32, %v278_v27  ;;  %v274_v37 = vrot.slane %v273_v33, 2  ;;  %v315_v32 = vadd.f32 %v314_v18, %v313_v11 }
  0x55   : > { %v327_v55 = vadd.f32 %v326_v49, %v325_v44  ;;  %v321_v58 = vrot.slane %v320_v54, 2 }
  0x56   : > { %v281_v38 = vrot.slane %v280_v36, 2  ;;  %v275_v41 = vadd.f32 %v274_v37, %v273_v33  ;;  %v706_v37 = vmov 1966171168  }
  0x57   : > { %v328_v59 = vrot.slane %v327_v55, 2  ;;  %v322_v62 = vadd.f32 %v321_v58, %v320_v54 }
  0x58   : > { %v282_v42 = vadd.f32 %v281_v38, %v280_v36  ;;  %v276_v45 = vrot.slane %v275_v41, 1  ;;  %v377_v38 = vunpack.c.l.s4 %v706_v37 }
  0x59   : > { %v329_v63 = vadd.f32 %v328_v59, %v327_v55  ;;  %v323_v2 = vrot.slane %v322_v62, 1 }
  0x5a   : > { %v283_v47 = vrot.slane %v282_v42, 1  ;;  %v277_v50 = vadd.f32 %v276_v45, %v275_v41 }
  0x5b   : > { %v330_v3 = vrot.slane %v329_v63, 1  ;;  %v324_v7 = vadd.f32 %v323_v2, %v322_v62 }
  0x5c   : > { %v284_v53 = vadd.f32 %v283_v47, %v282_v42  ;;  %586 = vrcp.f32 %v277_v50  ;;  %v378_v47 = vunpack.c.0.s8 %v377_v38 }
  0x5d   : > { %v331_v8 = vadd.f32 %v330_v3, %v329_v63 }
  0x5e   : > { %588 = vrcp.f32 %v284_v53  ;;  %v381_v54 = vsub.s32 %v378_v47, %v834_v25 }
  0x5f   : > { %590 = vlog2.f32 %v277_v50 }
  0x60   : > { %592 = vlog2.f32 %v284_v53 }
  0x69   : > { %v587_v6 = vpop.eup %586 }
  0x6a   : > { %v360_v15 = vmul.f32 %v587_v6, %v324_v7 }
  0x6b   : > { %v589_v9 = vpop.eup %588 }
  0x6c   : > { %v362_v16 = vmul.f32 %v589_v9, %v331_v8  ;;  %v591_v21 = vpop.eup %590  ;;  %v363_v29 = vsub.f32 1.0, %v360_v15 }
  0x6d   : > { %v593_v26 = vpop.eup %592  ;;  %v354_v35 = vmul.f32 0.6931472, %v591_v21 }
  0x6e   : > { %v364_v30 = vsub.f32 1.0, %v362_v16  ;;  %v356_v36 = vmul.f32 0.6931472, %v593_v26  ;;  %v365_v41 = vmul.f32 %v363_v29, %v363_v29 }
  0x6f   : > { %v357_v45 = vsub.f32 %v308_v31, %v354_v35 }
  0x70   : > { %v366_v42 = vmul.f32 %v364_v30, %v364_v30  ;;  %v358_v46 = vsub.f32 %v315_v32, %v356_v36  ;;  %v367_v50 = vmul.f32 -1.0, %v365_v41 }
  0x72   : > { %v368_v51 = vmul.f32 -1.0, %v366_v42 }
  0xa7   : > { %v335_v12 = vpop.permute.xlu0 %334 }
  0xa8   : > { %v337_v13 = vsel %vm295_vm2, %v335_v12, 0.0  ;;  %v338_v14 = vsel %vm296_vm3, %v335_v12, 0.0 }
  0xa9   : > { %v339_v19 = vsel %vm246_vm0, %v337_v13, 0.0  ;;  %v346_v20 = vsel %vm246_vm0, %v338_v14, 0.0 }
  0xaa   : > { %v340_v22 = vrot.slane %v339_v19, 4  ;;  %v347_v23 = vrot.slane %v346_v20, 4 }
  0xac   : > { %v341_v27 = vadd.f32 %v340_v22, %v339_v19  ;;  %v348_v28 = vadd.f32 %v347_v23, %v346_v20 }
  0xae   : > { %v342_v33 = vrot.slane %v341_v27, 2  ;;  %v349_v34 = vrot.slane %v348_v28, 2 }
  0xb0   : > { %v343_v39 = vadd.f32 %v342_v33, %v341_v27  ;;  %v350_v40 = vadd.f32 %v349_v34, %v348_v28 }
  0xb2   : > { %v344_v43 = vrot.slane %v343_v39, 1  ;;  %v351_v44 = vrot.slane %v350_v40, 1 }
  0xb4   : > { %v345_v48 = vadd.f32 %v344_v43, %v343_v39  ;;  %v352_v49 = vadd.f32 %v351_v44, %v350_v40 }
  0xb6   : > { %v369_v52 = vmul.f32 %v357_v45, %v345_v48  ;;  %v370_v53 = vmul.f32 %v358_v46, %v352_v49 }
  0xb8   : > { %v371_v55 = vmul.f32 %v369_v52, %v367_v50  ;;  %v372_v56 = vmul.f32 %v370_v53, %v368_v51 }
  0xba   : > { %v375_v57 = vcombine.low %v371_v55, %v372_v56 }
  0xbc   : > { %v382_v58 = vrot.slane %v375_v57, %v381_v54 }
  0xbe   : > { %v389_v59 = vrot.slane %v382_v58, %v381_v54 }
  0xc0   : > { %v391_v60 = vsel %vm241_vm1, %v389_v59, 0.0 }
  0xc1   : > { %v393_v61 = vrot.slane %v391_v60, 1 }
  0xc3   : > { %v395_v62 = vadd.f32 %v393_v61, %v391_v60 }
  0xc5   : > { %396 = vst [vmem:[%s227_s10] sm:$0x1] %v395_v62 }
  0xc6   : > { %635 = shalt.err (!%p632_p5)
}
  0xc7   : > { %s636_s4 = scalar_lea.hbm %s409_s21, 16  ;;  %s640_s5 = scalar_lea.hbm %s911_s3, 32 }
  0xc8   : > { %p637_p6 = scmp.ne.s32.totalorder %s409_s21, %s636_s4  ;;  %p641_p4 = scmp.lt.s32.totalorder %s409_s21, %s911_s3 }
  0xc9   : > { %p642_p13 = scmp.lt.s32.totalorder %s640_s5, %s636_s4 }
  0xca   : > { %p638_p7 = pnand %p637_p6, %p779_p9 }
  0xcb   : > { %p643_p8 = por %p642_p13, %p641_p4 }
  0xcc   : > { %p639_p10 = pneg %p638_p7 }
  0xce   : > { %p644_p11 = pnand %p643_p8, %p639_p10 }
  0xd0   : > { %647 = shalt.err (!%p644_p11)
}
  0xd1   : > { %520 = dma.vmem_to_hbm [thread:$0]  (%p779_p9), %s412_s11, 16, %s409_s21, %s398_s23  }
  0xd2 PF: > { %s423_s8 = sand.u32 1, %s682_s12   ;;  %p917_p12 = scmp.ne.s32.totalorder %s915_s27, 0 }
  0xd3   : > { %p918_p0 = scmp.ge.s32.totalorder %s702_s17, 2  ;;  %s424_s9 = scalar_lea.sflag [#allocation4], %s423_s8 }
  0xd5   : > { %p527_p1 = pnand %p918_p0, %p917_p12 }
  0xd7   : > { %p528_p2 = pneg %p527_p1 }
  0xd9   : > { %677 = dma.done.wait (%p528_p2), %s424_s9, 16  }
  0xda   : > { %679 = vsyncadd (%p528_p2), %s424_s9, 4294967280  ;;  %s19_s17 = sadd.s32 1, %s702_s17   ;;  %s919_s12 = smov %s686_s13 }
  0xdb   : > { %p16_p3 = scmp.ge.s32.totalorder %s19_s17, 4   ;;  %s920_s13 = smov %s690_s14 }
  0xdc   : > { %s921_s14 = smov %s784_s26  ;;  %s922_s15 = smov %s698_s16 }
  0xdd   : > { %s923_s16 = smov %s925_s20  ;;  %18 = sbr.rel (!%p16_p3) target bundleno = 6 (0x6), region = 80 }
  0xe2   :  { %428 = vsyncpa [#allocation3], 1 }
  0xe3   :  { %430 = vsyncpa [#allocation3 + $0x1], 1 }
  0xe4   :  { %431 = vsyncpa [#allocation4], 1 }
  0xe5   :  { %433 = vsyncpa [#allocation4 + $0x1], 1 }

</bundles_post_ra>
